<compile_context>
chip_gen: v6e
topology: v6e:2x2x1
jax: 0.10.0
libtpu: 0.0.40
codegen_flags: <defaults>
</compile_context>

<pallas_src>
import functools

import jax
import jax.numpy as jnp
from jax.experimental import pallas as pl
from jax.experimental.pallas import tpu as pltpu


# ----------------------------------------------------------------------------
# Kernel
# ----------------------------------------------------------------------------
def _loco_kernel(num_stage, linear_size,
                 x_ref,       # (bt, F_in)                 f32
                 w1_ref,      # (F_in, L)                  bf16  (bn1 folded)
                 stw_ref,     # (num_stage, 2, L, L)       bf16  (bn folded)
                 w3x_ref,     # (L, L + out_dim)           bf16  [w2@w3 | 0 | w2@waux]
                 wfin_ref,    # (L, out_dim)               bf16  [w_fin | 0]
                 bias_ref,    # (2 + 2*num_stage, L)       f32   stacked biases
                 blast_ref,   # (1, out_dim)               f32   [b_fin | b_aux_folded]
                 out_ref):    # (bt, out_dim)              f32
    cdt = jnp.bfloat16
    L = linear_size

    # y = relu(bn1(w1(x)))   (dropout = identity in eval mode)
    x = x_ref[...].astype(cdt)
    y = jnp.dot(x, w1_ref[...], preferred_element_type=jnp.float32)
    y = jnp.maximum(y + bias_ref[0:1, :], 0.0)

    # Residual MyLinearSimple stages (static unroll).
    for i in range(num_stage):
        h = jnp.dot(y.astype(cdt), stw_ref[i, 0],
                    preferred_element_type=jnp.float32)
        h = jnp.maximum(h + bias_ref[1 + 2 * i: 2 + 2 * i, :], 0.0)
        h = jnp.dot(h.astype(cdt), stw_ref[i, 1],
                    preferred_element_type=jnp.float32)
        h = jnp.maximum(h + bias_ref[2 + 2 * i: 3 + 2 * i, :], 0.0)
        y = y + h

    # Single matmul producing both the w3 pre-activation (cols :L) and the
    # (pre-bias) aux column block (cols L:).  w2 and bn3 are pre-folded.
    y_b = y.astype(cdt)
    p = jnp.dot(y_b, w3x_ref[...], preferred_element_type=jnp.float32)
    z = jnp.maximum(p[:, :L] + bias_ref[1 + 2 * num_stage: 2 + 2 * num_stage, :],
                    0.0)
    aux_block = p[:, L:]                     # (bt, out_dim): [0 ... 0, aux_pre]

    # out = cat([w_fin(z), aux], dim=1) as one slab -> single store.
    out = (jnp.dot(z.astype(cdt), wfin_ref[...],
                   preferred_element_type=jnp.float32)
           + aux_block + blast_ref[...])
    out_ref[...] = out


# ----------------------------------------------------------------------------
# Batch tiling policy
# ----------------------------------------------------------------------------
def _choose_batch_tile(B, cap=1024):
    """Return (batch_tile, padded_B).

    - tile is a multiple of 8 sublanes, capped at `cap`.
    - small batches get a single grid step (latency case).
    - large batches are split into an EVEN number of steps so
      dimension_semantics=("parallel",) balances across both v7x TensorCores.
    - B is padded up to a tile multiple (never a lone awkward block).
    """
    B8 = ((B + 7) // 8) * 8
    if B8 <= 512:
        return B8, B8
    n_steps = max(2, -(-B8 // cap))
    if n_steps % 2:
        n_steps += 1
    tile = min(cap, ((-(-B8 // n_steps) + 7) // 8) * 8)
    padded = ((B8 + tile - 1) // tile) * tile
    return tile, padded


# ----------------------------------------------------------------------------
# Wrapper
# ----------------------------------------------------------------------------
def loco_forward(x, fp, *, num_stage, batch_tile=None):
    B, F_in = x.shape
    L = fp["w1"].shape[1]
    out_dim = fp["wfin"].shape[1]

    if batch_tile is None:
        batch_tile, B_pad = _choose_batch_tile(B)
    else:
        batch_tile = max(8, ((batch_tile + 7) // 8) * 8)
        B_pad = ((B + batch_tile - 1) // batch_tile) * batch_tile

    if B_pad != B:
        x = jnp.pad(x, ((0, B_pad - B), (0, 0)))
    grid = (B_pad // batch_tile,)

    def full_spec(shape):
        nd = len(shape)
        return pl.BlockSpec(shape, lambda i, nd=nd: (0,) * nd)

    in_specs = [
        pl.BlockSpec((batch_tile, F_in), lambda i: (i, 0)),   # x tiled over batch
        full_spec(fp["w1"].shape),
        full_spec(fp["stw"].shape),
        full_spec(fp["w3x"].shape),
        full_spec(fp["wfin"].shape),
        full_spec(fp["bias"].shape),
        full_spec(fp["blast"].shape),
    ]
    out_spec = pl.BlockSpec((batch_tile, out_dim), lambda i: (i, 0))

    kernel = functools.partial(_loco_kernel, num_stage, L)

    # Advisory cost estimate (MACs * 2).
    macs = F_in * L + 2 * num_stage * L * L + L * (L + out_dim) + L * out_dim
    weight_bytes = sum(int(fp[k].size) * fp[k].dtype.itemsize
                       for k in ("w1", "stw", "w3x", "wfin", "bias", "blast"))
    cost = pl.CostEstimate(
        flops=int(2 * B_pad * macs),
        transcendentals=0,
        bytes_accessed=int(B_pad * F_in * 4 + weight_bytes + B_pad * out_dim * 4),
    )

    # NOTE: at L=128 the whole weight set is <0.3 MiB so double-buffered
    # constant blocks are harmless even on v7x (64 MiB VMEM).  For much larger
    # linear_size, single-buffer the weight specs (pipeline_mode=pl.Buffered(1))
    # or raise vmem_limit_bytes.
    out = pl.pallas_call(
        kernel,
        out_shape=jax.ShapeDtypeStruct((B_pad, out_dim), jnp.float32),
        grid=grid,
        in_specs=in_specs,
        out_specs=out_spec,
        compiler_params=pltpu.CompilerParams(
            dimension_semantics=("parallel",)),
        cost_estimate=cost,
    )(x, fp["w1"], fp["stw"], fp["w3x"], fp["wfin"], fp["bias"], fp["blast"])

    return out[:B] if B_pad != B else out


# ----------------------------------------------------------------------------
# Parameter construction (PyTorch-like original params) + offline folding
# ----------------------------------------------------------------------------
def init_params(key, input_size, linear_size, output_size, num_stage):
    """Synthetic eval-mode parameters in the original (unfolded) form."""
    L = linear_size
    out_fin = output_size - 1
    keys = iter(jax.random.split(key, 64))

    def lin(fan_in, fan_out):
        kw, kb = jax.random.split(next(keys))
        w = jax.random.normal(kw, (fan_in, fan_out), jnp.float32) * 0.05
        b = jax.random.normal(kb, (1, fan_out), jnp.float32) * 0.05
        return w, b

    def bn(n):
        kg, kb, km, kv = jax.random.split(next(keys), 4)
        g = 1.0 + 0.1 * jax.random.normal(kg, (1, n), jnp.float32)
        be = 0.1 * jax.random.normal(kb, (1, n), jnp.float32)
        m = 0.1 * jax.random.normal(km, (1, n), jnp.float32)
        v = 1.0 + 0.2 * jax.random.uniform(kv, (1, n), jnp.float32)
        return g, be, m, v

    p = {}
    p["w1"], p["b1"] = lin(input_size, L)
    p["g1"], p["be1"], p["m1"], p["v1"] = bn(L)

    for name in ("stw", "stb", "stg", "stbe", "stm", "stv"):
        p[name] = []
    for _ in range(num_stage):
        ws, bs, gs, bes, ms, vs = [], [], [], [], [], []
        for _ in range(2):
            w, b = lin(L, L)
            g, be, m, v = bn(L)
            ws.append(w); bs.append(b); gs.append(g)
            bes.append(be); ms.append(m); vs.append(v)
        p["stw"].append(ws); p["stb"].append(bs); p["stg"].append(gs)
        p["stbe"].append(bes); p["stm"].append(ms); p["stv"].append(vs)

    p["w2"], p["b2"] = lin(L, L)
    p["w3"], p["b3"] = lin(L, L)
    p["g3"], p["be3"], p["m3"], p["v3"] = bn(L)
    p["waux"], p["baux"] = lin(L, 1)
    p["wfin"], p["bfin"] = lin(L, out_fin)
    return p


def fold_params(p, *, num_stage, eps=1e-5, compute_dtype=jnp.bfloat16):
    """Offline folding: BN -> preceding Linear, w2 -> (w3, w_aux), aux -> w3x,
    bias stack."""
    def bn_fold(w, b, g, be, m, v):
        scale = g / jnp.sqrt(v + eps)
        return w * scale, b * scale + (be - m * scale)

    L = p["w1"].shape[1]
    out_fin = p["wfin"].shape[1]
    out_dim = out_fin + 1

    w1f, b1f = bn_fold(p["w1"], p["b1"], p["g1"], p["be1"], p["m1"], p["v1"])

    stage_ws, biases = [], [b1f]
    for i in range(num_stage):
        for j in range(2):
            wf, bf = bn_fold(p["stw"][i][j], p["stb"][i][j], p["stg"][i][j],
                             p["stbe"][i][j], p["stm"][i][j], p["stv"][i][j])
            stage_ws.append(wf)
            biases.append(bf)
    stwf = jnp.stack(stage_ws).reshape(num_stage, 2, L, L)

    # Fold w2 (no nonlinearity in between) and bn3 into a single linear,
    # and fold (w2 @ w_aux) in as trailing output columns of the same matmul.
    w3s, b3s = bn_fold(p["w3"], p["b3"], p["g3"], p["be3"], p["m3"], p["v3"])
    w3f = p["w2"] @ w3s                                    # (L, L)
    b3f = p["b2"] @ w3s + b3s                              # (1, L)
    biases.append(b3f)

    wauxf = p["w2"] @ p["waux"]                            # (L, 1)
    bauxf = p["b2"] @ p["waux"] + p["baux"]                # (1, 1)

    w3x = jnp.concatenate(
        [w3f, jnp.zeros((L, out_fin), jnp.float32), wauxf], axis=1)   # (L, L+out_dim)
    wfin_pad = jnp.concatenate(
        [p["wfin"], jnp.zeros((L, 1), jnp.float32)], axis=1)          # (L, out_dim)
    blast = jnp.concatenate([p["bfin"], bauxf], axis=1)               # (1, out_dim)

    bias = jnp.concatenate(biases, axis=0)                 # (2 + 2*num_stage, L)

    cd = compute_dtype
    return dict(w1=w1f.astype(cd), stw=stwf.astype(cd), w3x=w3x.astype(cd),
                wfin=wfin_pad.astype(cd),
                bias=bias.astype(jnp.float32), blast=blast.astype(jnp.float32))


# ----------------------------------------------------------------------------
# References
# ----------------------------------------------------------------------------
def loco_reference_f32(x, p, num_stage, eps=1e-5):
    """Original (unfolded, f32) eval-mode LocoModel forward."""
    def bn(z, g, be, m, v):
        return (z - m) / jnp.sqrt(v + eps) * g + be

    y = x @ p["w1"] + p["b1"]
    y = jnp.maximum(bn(y, p["g1"], p["be1"], p["m1"], p["v1"]), 0.0)
    for i in range(num_stage):
        h = y
        for j in range(2):
            h = h @ p["stw"][i][j] + p["stb"][i][j]
            h = jnp.maximum(bn(h, p["stg"][i][j], p["stbe"][i][j],
                               p["stm"][i][j], p["stv"][i][j]), 0.0)
        y = y + h
    y = y @ p["w2"] + p["b2"]
    aux = y @ p["waux"] + p["baux"]
    y = y @ p["w3"] + p["b3"]
    y = jnp.maximum(bn(y, p["g3"], p["be3"], p["m3"], p["v3"]), 0.0)
    yfin = y @ p["wfin"] + p["bfin"]
    return jnp.concatenate([yfin, aux], axis=1)


def loco_reference_folded(x, fp, num_stage):
    """Pure-JAX replica of the kernel math (bf16 operands, f32 accumulation)."""
    cd = jnp.bfloat16
    L = fp["w1"].shape[1]

    def mm(a, w):
        return jnp.dot(a.astype(cd), w, preferred_element_type=jnp.float32)

    b = fp["bias"]
    y = jnp.maximum(mm(x, fp["w1"]) + b[0:1], 0.0)
    for i in range(num_stage):
        h = jnp.maximum(mm(y, fp["stw"][i, 0]) + b[1 + 2 * i: 2 + 2 * i], 0.0)
        h = jnp.maximum(mm(h, fp["stw"][i, 1]) + b[2 + 2 * i: 3 + 2 * i], 0.0)
        y = y + h
    p = mm(y, fp["w3x"])
    z = jnp.maximum(p[:, :L] + b[1 + 2 * num_stage: 2 + 2 * num_stage], 0.0)
    return mm(z, fp["wfin"]) + p[:, L:] + fp["blast"]


# ----------------------------------------------------------------------------
if __name__ == "__main__":
    INPUT_SIZE = 32       # stereo_size
    LINEAR_SIZE = 128
    OUTPUT_SIZE = 2       # w_fin outputs OUTPUT_SIZE-1, concat with aux -> 2
    NUM_STAGE = 3
    BATCH = 8

    key = jax.random.PRNGKey(0)
    kx, kp = jax.random.split(key)
    x = jax.random.normal(kx, (BATCH, INPUT_SIZE), jnp.float32)

    params = init_params(kp, INPUT_SIZE, LINEAR_SIZE, OUTPUT_SIZE, NUM_STAGE)
    fparams = fold_params(params, num_stage=NUM_STAGE)

    out = loco_forward(x, fparams, num_stage=NUM_STAGE)
    out = jax.block_until_ready(out)
    assert out.shape == (BATCH, OUTPUT_SIZE)

    # Tight check: same bf16/f32-accum math as the kernel.
    ref_folded = loco_reference_folded(x, fparams, NUM_STAGE)
    assert jnp.allclose(out, ref_folded, atol=1e-2, rtol=1e-2), \
        "mismatch vs folded (bf16) JAX reference"

    # Looser check against the original unfolded f32 model (bf16 weight
    # quantization of folded products is the only source of difference).
    ref_f32 = loco_reference_f32(x, params, NUM_STAGE)
    assert jnp.allclose(out, ref_f32, atol=5e-2, rtol=5e-2), \
        "mismatch vs original f32 reference"

    # Exercise the padded / non-multiple-of-8 batch path.
    x2 = jax.random.normal(jax.random.PRNGKey(1), (5, INPUT_SIZE), jnp.float32)
    out2 = jax.block_until_ready(loco_forward(x2, fparams, num_stage=NUM_STAGE))
    ref2 = loco_reference_folded(x2, fparams, NUM_STAGE)
    assert out2.shape == (5, OUTPUT_SIZE)
    assert jnp.allclose(out2, ref2, atol=1e-2, rtol=1e-2), \
        "mismatch on padded-batch path"

    print("KERNEL_OK")
</pallas_src>

<mosaic_0001>
module attributes {stable_mosaic.version = 11 : i64} {
  func.func @_loco_kernel(%arg0: i32, %arg1: memref<8x32xf32, #tpu.memory_space<vmem>>, %arg2: memref<32x128xbf16, #tpu.memory_space<vmem>>, %arg3: memref<3x2x128x128xbf16, #tpu.memory_space<vmem>>, %arg4: memref<128x130xbf16, #tpu.memory_space<vmem>>, %arg5: memref<128x2xbf16, #tpu.memory_space<vmem>>, %arg6: memref<8x128xf32, #tpu.memory_space<vmem>>, %arg7: memref<1x2xf32, #tpu.memory_space<vmem>>, %arg8: memref<8x2xf32, #tpu.memory_space<vmem>>) attributes {dimension_semantics = [#tpu.dimension_semantics<parallel>], iteration_bounds = array<i64: 1>, scalar_prefetch = 0 : i64, scratch_operands = 0 : i64, tpu.core_type = #tpu.core_type<tc>, window_params = [{transform_indices = @transform_0, window_bounds = array<i64: 8, 32>}, {pipeline_mode = #tpu.pipeline_mode<synchronous>, transform_indices = @transform_1, window_bounds = array<i64: 32, 128>}, {pipeline_mode = #tpu.pipeline_mode<synchronous>, transform_indices = @transform_2, window_bounds = array<i64: 3, 2, 128, 128>}, {pipeline_mode = #tpu.pipeline_mode<synchronous>, transform_indices = @transform_3, window_bounds = array<i64: 128, 130>}, {pipeline_mode = #tpu.pipeline_mode<synchronous>, transform_indices = @transform_4, window_bounds = array<i64: 128, 2>}, {pipeline_mode = #tpu.pipeline_mode<synchronous>, transform_indices = @transform_5, window_bounds = array<i64: 8, 128>}, {pipeline_mode = #tpu.pipeline_mode<synchronous>, transform_indices = @transform_6, window_bounds = array<i64: 1, 2>}, {transform_indices = @transform_7, window_bounds = array<i64: 8, 2>}]} {
    %c0 = arith.constant 0 : index
    %c0_0 = arith.constant 0 : index
    %0 = vector.load %arg1[%c0, %c0_0] : memref<8x32xf32, #tpu.memory_space<vmem>>, vector<8x32xf32>
    %1 = arith.truncf %0 : vector<8x32xf32> to vector<8x32xbf16>
    %c0_1 = arith.constant 0 : index
    %c0_2 = arith.constant 0 : index
    %2 = vector.load %arg2[%c0_1, %c0_2] : memref<32x128xbf16, #tpu.memory_space<vmem>>, vector<32x128xbf16>
    %cst = arith.constant dense<0.000000e+00> : vector<8x128xf32>
    %3 = tpu.matmul %1, %2, %cst {dimension_numbers = #tpu.dot_dimension_numbers<[1], [0], [0], [1], [0, 0, 1, 1], [], []>} : vector<8x32xbf16>, vector<32x128xbf16>, vector<8x128xf32> -> vector<8x128xf32>
    %c0_3 = arith.constant 0 : index
    %c0_4 = arith.constant 0 : index
    %4 = vector.load %arg6[%c0_3, %c0_4] : memref<8x128xf32, #tpu.memory_space<vmem>>, vector<1x128xf32>
    %5 = vector.broadcast %4 : vector<1x128xf32> to vector<8x128xf32>
    %6 = arith.addf %3, %5 : vector<8x128xf32>
    %cst_5 = arith.constant 0.000000e+00 : f32
    %7 = vector.broadcast %cst_5 : f32 to vector<8x128xf32>
    %8 = arith.maximumf %6, %7 : vector<8x128xf32>
    %9 = arith.truncf %8 : vector<8x128xf32> to vector<8x128xbf16>
    %c0_6 = arith.constant 0 : index
    %c0_7 = arith.constant 0 : index
    %c0_8 = arith.constant 0 : index
    %c0_9 = arith.constant 0 : index
    %10 = vector.load %arg3[%c0_6, %c0_7, %c0_8, %c0_9] : memref<3x2x128x128xbf16, #tpu.memory_space<vmem>>, vector<1x1x128x128xbf16>
    %11 = vector.shape_cast %10 : vector<1x1x128x128xbf16> to vector<128x128xbf16>
    %cst_10 = arith.constant dense<0.000000e+00> : vector<8x128xf32>
    %12 = tpu.matmul %9, %11, %cst_10 {dimension_numbers = #tpu.dot_dimension_numbers<[1], [0], [0], [1], [0, 0, 1, 1], [], []>} : vector<8x128xbf16>, vector<128x128xbf16>, vector<8x128xf32> -> vector<8x128xf32>
    %c1 = arith.constant 1 : index
    %c0_11 = arith.constant 0 : index
    %13 = vector.load %arg6[%c1, %c0_11] : memref<8x128xf32, #tpu.memory_space<vmem>>, vector<1x128xf32>
    %14 = vector.broadcast %13 : vector<1x128xf32> to vector<8x128xf32>
    %15 = arith.addf %12, %14 : vector<8x128xf32>
    %cst_12 = arith.constant 0.000000e+00 : f32
    %16 = vector.broadcast %cst_12 : f32 to vector<8x128xf32>
    %17 = arith.maximumf %15, %16 : vector<8x128xf32>
    %18 = arith.truncf %17 : vector<8x128xf32> to vector<8x128xbf16>
    %c0_13 = arith.constant 0 : index
    %c1_14 = arith.constant 1 : index
    %c0_15 = arith.constant 0 : index
    %c0_16 = arith.constant 0 : index
    %19 = vector.load %arg3[%c0_13, %c1_14, %c0_15, %c0_16] : memref<3x2x128x128xbf16, #tpu.memory_space<vmem>>, vector<1x1x128x128xbf16>
    %20 = vector.shape_cast %19 : vector<1x1x128x128xbf16> to vector<128x128xbf16>
    %cst_17 = arith.constant dense<0.000000e+00> : vector<8x128xf32>
    %21 = tpu.matmul %18, %20, %cst_17 {dimension_numbers = #tpu.dot_dimension_numbers<[1], [0], [0], [1], [0, 0, 1, 1], [], []>} : vector<8x128xbf16>, vector<128x128xbf16>, vector<8x128xf32> -> vector<8x128xf32>
    %c2 = arith.constant 2 : index
    %c0_18 = arith.constant 0 : index
    %22 = vector.load %arg6[%c2, %c0_18] : memref<8x128xf32, #tpu.memory_space<vmem>>, vector<1x128xf32>
    %23 = vector.broadcast %22 : vector<1x128xf32> to vector<8x128xf32>
    %24 = arith.addf %21, %23 : vector<8x128xf32>
    %cst_19 = arith.constant 0.000000e+00 : f32
    %25 = vector.broadcast %cst_19 : f32 to vector<8x128xf32>
    %26 = arith.maximumf %24, %25 : vector<8x128xf32>
    %27 = arith.addf %8, %26 : vector<8x128xf32>
    %28 = arith.truncf %27 : vector<8x128xf32> to vector<8x128xbf16>
    %c1_20 = arith.constant 1 : index
    %c0_21 = arith.constant 0 : index
    %c0_22 = arith.constant 0 : index
    %c0_23 = arith.constant 0 : index
    %29 = vector.load %arg3[%c1_20, %c0_21, %c0_22, %c0_23] : memref<3x2x128x128xbf16, #tpu.memory_space<vmem>>, vector<1x1x128x128xbf16>
    %30 = vector.shape_cast %29 : vector<1x1x128x128xbf16> to vector<128x128xbf16>
    %cst_24 = arith.constant dense<0.000000e+00> : vector<8x128xf32>
    %31 = tpu.matmul %28, %30, %cst_24 {dimension_numbers = #tpu.dot_dimension_numbers<[1], [0], [0], [1], [0, 0, 1, 1], [], []>} : vector<8x128xbf16>, vector<128x128xbf16>, vector<8x128xf32> -> vector<8x128xf32>
    %c3 = arith.constant 3 : index
    %c0_25 = arith.constant 0 : index
    %32 = vector.load %arg6[%c3, %c0_25] : memref<8x128xf32, #tpu.memory_space<vmem>>, vector<1x128xf32>
    %33 = vector.broadcast %32 : vector<1x128xf32> to vector<8x128xf32>
    %34 = arith.addf %31, %33 : vector<8x128xf32>
    %cst_26 = arith.constant 0.000000e+00 : f32
    %35 = vector.broadcast %cst_26 : f32 to vector<8x128xf32>
    %36 = arith.maximumf %34, %35 : vector<8x128xf32>
    %37 = arith.truncf %36 : vector<8x128xf32> to vector<8x128xbf16>
    %c1_27 = arith.constant 1 : index
    %c1_28 = arith.constant 1 : index
    %c0_29 = arith.constant 0 : index
    %c0_30 = arith.constant 0 : index
    %38 = vector.load %arg3[%c1_27, %c1_28, %c0_29, %c0_30] : memref<3x2x128x128xbf16, #tpu.memory_space<vmem>>, vector<1x1x128x128xbf16>
    %39 = vector.shape_cast %38 : vector<1x1x128x128xbf16> to vector<128x128xbf16>
    %cst_31 = arith.constant dense<0.000000e+00> : vector<8x128xf32>
    %40 = tpu.matmul %37, %39, %cst_31 {dimension_numbers = #tpu.dot_dimension_numbers<[1], [0], [0], [1], [0, 0, 1, 1], [], []>} : vector<8x128xbf16>, vector<128x128xbf16>, vector<8x128xf32> -> vector<8x128xf32>
    %c4 = arith.constant 4 : index
    %c0_32 = arith.constant 0 : index
    %41 = vector.load %arg6[%c4, %c0_32] : memref<8x128xf32, #tpu.memory_space<vmem>>, vector<1x128xf32>
    %42 = vector.broadcast %41 : vector<1x128xf32> to vector<8x128xf32>
    %43 = arith.addf %40, %42 : vector<8x128xf32>
    %cst_33 = arith.constant 0.000000e+00 : f32
    %44 = vector.broadcast %cst_33 : f32 to vector<8x128xf32>
    %45 = arith.maximumf %43, %44 : vector<8x128xf32>
    %46 = arith.addf %27, %45 : vector<8x128xf32>
    %47 = arith.truncf %46 : vector<8x128xf32> to vector<8x128xbf16>
    %c2_34 = arith.constant 2 : index
    %c0_35 = arith.constant 0 : index
    %c0_36 = arith.constant 0 : index
    %c0_37 = arith.constant 0 : index
    %48 = vector.load %arg3[%c2_34, %c0_35, %c0_36, %c0_37] : memref<3x2x128x128xbf16, #tpu.memory_space<vmem>>, vector<1x1x128x128xbf16>
    %49 = vector.shape_cast %48 : vector<1x1x128x128xbf16> to vector<128x128xbf16>
    %cst_38 = arith.constant dense<0.000000e+00> : vector<8x128xf32>
    %50 = tpu.matmul %47, %49, %cst_38 {dimension_numbers = #tpu.dot_dimension_numbers<[1], [0], [0], [1], [0, 0, 1, 1], [], []>} : vector<8x128xbf16>, vector<128x128xbf16>, vector<8x128xf32> -> vector<8x128xf32>
    %c5 = arith.constant 5 : index
    %c0_39 = arith.constant 0 : index
    %51 = vector.load %arg6[%c5, %c0_39] : memref<8x128xf32, #tpu.memory_space<vmem>>, vector<1x128xf32>
    %52 = vector.broadcast %51 : vector<1x128xf32> to vector<8x128xf32>
    %53 = arith.addf %50, %52 : vector<8x128xf32>
    %cst_40 = arith.constant 0.000000e+00 : f32
    %54 = vector.broadcast %cst_40 : f32 to vector<8x128xf32>
    %55 = arith.maximumf %53, %54 : vector<8x128xf32>
    %56 = arith.truncf %55 : vector<8x128xf32> to vector<8x128xbf16>
    %c2_41 = arith.constant 2 : index
    %c1_42 = arith.constant 1 : index
    %c0_43 = arith.constant 0 : index
    %c0_44 = arith.constant 0 : index
    %57 = vector.load %arg3[%c2_41, %c1_42, %c0_43, %c0_44] : memref<3x2x128x128xbf16, #tpu.memory_space<vmem>>, vector<1x1x128x128xbf16>
    %58 = vector.shape_cast %57 : vector<1x1x128x128xbf16> to vector<128x128xbf16>
    %cst_45 = arith.constant dense<0.000000e+00> : vector<8x128xf32>
    %59 = tpu.matmul %56, %58, %cst_45 {dimension_numbers = #tpu.dot_dimension_numbers<[1], [0], [0], [1], [0, 0, 1, 1], [], []>} : vector<8x128xbf16>, vector<128x128xbf16>, vector<8x128xf32> -> vector<8x128xf32>
    %c6 = arith.constant 6 : index
    %c0_46 = arith.constant 0 : index
    %60 = vector.load %arg6[%c6, %c0_46] : memref<8x128xf32, #tpu.memory_space<vmem>>, vector<1x128xf32>
    %61 = vector.broadcast %60 : vector<1x128xf32> to vector<8x128xf32>
    %62 = arith.addf %59, %61 : vector<8x128xf32>
    %cst_47 = arith.constant 0.000000e+00 : f32
    %63 = vector.broadcast %cst_47 : f32 to vector<8x128xf32>
    %64 = arith.maximumf %62, %63 : vector<8x128xf32>
    %65 = arith.addf %46, %64 : vector<8x128xf32>
    %66 = arith.truncf %65 : vector<8x128xf32> to vector<8x128xbf16>
    %c0_48 = arith.constant 0 : index
    %c0_49 = arith.constant 0 : index
    %67 = vector.load %arg4[%c0_48, %c0_49] : memref<128x130xbf16, #tpu.memory_space<vmem>>, vector<128x130xbf16>
    %cst_50 = arith.constant dense<0.000000e+00> : vector<8x130xf32>
    %68 = tpu.matmul %66, %67, %cst_50 {dimension_numbers = #tpu.dot_dimension_numbers<[1], [0], [0], [1], [0, 0, 1, 1], [], []>} : vector<8x128xbf16>, vector<128x130xbf16>, vector<8x130xf32> -> vector<8x130xf32>
    %69 = vector.extract_strided_slice %68 {offsets = [0, 0], sizes = [8, 128], strides = [1, 1]} : vector<8x130xf32> to vector<8x128xf32>
    %c7 = arith.constant 7 : index
    %c0_51 = arith.constant 0 : index
    %70 = vector.load %arg6[%c7, %c0_51] : memref<8x128xf32, #tpu.memory_space<vmem>>, vector<1x128xf32>
    %71 = vector.broadcast %70 : vector<1x128xf32> to vector<8x128xf32>
    %72 = arith.addf %69, %71 : vector<8x128xf32>
    %cst_52 = arith.constant 0.000000e+00 : f32
    %73 = vector.broadcast %cst_52 : f32 to vector<8x128xf32>
    %74 = arith.maximumf %72, %73 : vector<8x128xf32>
    %75 = vector.extract_strided_slice %68 {offsets = [0, 128], sizes = [8, 2], strides = [1, 1]} : vector<8x130xf32> to vector<8x2xf32>
    %76 = arith.truncf %74 : vector<8x128xf32> to vector<8x128xbf16>
    %c0_53 = arith.constant 0 : index
    %c0_54 = arith.constant 0 : index
    %77 = vector.load %arg5[%c0_53, %c0_54] : memref<128x2xbf16, #tpu.memory_space<vmem>>, vector<128x2xbf16>
    %cst_55 = arith.constant dense<0.000000e+00> : vector<8x2xf32>
    %78 = tpu.matmul %76, %77, %cst_55 {dimension_numbers = #tpu.dot_dimension_numbers<[1], [0], [0], [1], [0, 0, 1, 1], [], []>} : vector<8x128xbf16>, vector<128x2xbf16>, vector<8x2xf32> -> vector<8x2xf32>
    %79 = arith.addf %78, %75 : vector<8x2xf32>
    %c0_56 = arith.constant 0 : index
    %c0_57 = arith.constant 0 : index
    %80 = vector.load %arg7[%c0_56, %c0_57] : memref<1x2xf32, #tpu.memory_space<vmem>>, vector<1x2xf32>
    %81 = vector.broadcast %80 : vector<1x2xf32> to vector<8x2xf32>
    %82 = arith.addf %79, %81 : vector<8x2xf32>
    %c0_58 = arith.constant 0 : index
    %c0_59 = arith.constant 0 : index
    %83 = vector.load %arg8[%c0_58, %c0_59] : memref<8x2xf32, #tpu.memory_space<vmem>>, vector<8x2xf32>
    tpu.vector_store %arg8[%c0_58, %c0_59], %82 {strides = array<i32>} : memref<8x2xf32, #tpu.memory_space<vmem>>, vector<8x2xf32>,
    return
  }
  func.func @transform_0(%arg0: i32) -> (i32, i32) {
    %c0_i32 = arith.constant 0 : i32
    %c0_i32_0 = arith.constant 0 : i32
    return %arg0, %c0_i32 : i32, i32
  }
  func.func @transform_1(%arg0: i32) -> (i32, i32) {
    %c0_i32 = arith.constant 0 : i32
    %c0_i32_0 = arith.constant 0 : i32
    %c0_i32_1 = arith.constant 0 : i32
    return %c0_i32, %c0_i32_0 : i32, i32
  }
  func.func @transform_2(%arg0: i32) -> (i32, i32, i32, i32) {
    %c0_i32 = arith.constant 0 : i32
    %c0_i32_0 = arith.constant 0 : i32
    %c0_i32_1 = arith.constant 0 : i32
    %c0_i32_2 = arith.constant 0 : i32
    %c0_i32_3 = arith.constant 0 : i32
    return %c0_i32, %c0_i32_0, %c0_i32_1, %c0_i32_2 : i32, i32, i32, i32
  }
  func.func @transform_3(%arg0: i32) -> (i32, i32) {
    %c0_i32 = arith.constant 0 : i32
    %c0_i32_0 = arith.constant 0 : i32
    %c0_i32_1 = arith.constant 0 : i32
    return %c0_i32, %c0_i32_0 : i32, i32
  }
  func.func @transform_4(%arg0: i32) -> (i32, i32) {
    %c0_i32 = arith.constant 0 : i32
    %c0_i32_0 = arith.constant 0 : i32
    %c0_i32_1 = arith.constant 0 : i32
    return %c0_i32, %c0_i32_0 : i32, i32
  }
  func.func @transform_5(%arg0: i32) -> (i32, i32) {
    %c0_i32 = arith.constant 0 : i32
    %c0_i32_0 = arith.constant 0 : i32
    %c0_i32_1 = arith.constant 0 : i32
    return %c0_i32, %c0_i32_0 : i32, i32
  }
  func.func @transform_6(%arg0: i32) -> (i32, i32) {
    %c0_i32 = arith.constant 0 : i32
    %c0_i32_0 = arith.constant 0 : i32
    %c0_i32_1 = arith.constant 0 : i32
    return %c0_i32, %c0_i32_0 : i32, i32
  }
  func.func @transform_7(%arg0: i32) -> (i32, i32) {
    %c0_i32 = arith.constant 0 : i32
    %c0_i32_0 = arith.constant 0 : i32
    return %arg0, %c0_i32 : i32, i32
  }
}

</mosaic_0001>

<bundles_post_ra>
// kernel: tpu_custom_call.1
= control target key start
LH: loop header
LB: loop body
LE: loop exit
PB: predicated region body
PF: predicated region fallthrough
CT: control target
= control target key end

     0   :  { %12 = vsyncpa [#allocation3], 0  ;;  %s1456_s24 = smov [#allocation2]   ;;  %s1705_s0 = inlined_call_operand.vmem [shape: f32[8,32], index: 0, kind: input, shape index: {}]   ;;  %s1706_s1 = inlined_call_operand.vmem [shape: bf16[32,128], index: 1, kind: input, shape index: {}]   ;;  %s1707_s2 = inlined_call_operand.hbm [shape: bf16[3,2,128,128], index: 2, kind: input, shape index: {}]   ;;  %s1708_s3 = inlined_call_operand.vmem [shape: bf16[128,130], index: 3, kind: input, shape index: {}]   ;;  %s1709_s4 = inlined_call_operand.vmem [shape: bf16[128,2], index: 4, kind: input, shape index: {}]   ;;  %s1710_s5 = inlined_call_operand.vmem [shape: f32[8,128], index: 5, kind: input, shape index: {}]   ;;  %s1711_s6 = inlined_call_operand.vmem [shape: f32[1,2], index: 6, kind: input, shape index: {}]   ;;  %s1712_s7 = inlined_call_operand.vmem [shape: f32[8,2], index: 7, kind: output, shape index: {}]  }
   0x1   :  { %s22_s25 = sshll.u32 %s1456_s24, 4  ;;  %s23_s25 = int_to_ptr.vmem [resolvable:$true] %s22_s25 }
   0x2   :  { %s1442_s26 = scalar_lea.vmem %s23_s25, 6144  ;;  %p1447_p1 = scmp.lt.s32.totalorder %s23_s25, %s23_s25 }
   0x3   :  { %p1443_p0 = scmp.ne.s32.totalorder %s23_s25, %s1442_s26  ;;  %p1448_p2 = scmp.lt.s32.totalorder %s1442_s26, %s1442_s26 }
   0x5   :  { %p1449_p3 = por %p1448_p2, %p1447_p1 }
   0x7   :  { %p1450_p4 = pnand %p1449_p3, %p1443_p0 }
   0x9   :  { %1453 = shalt.err (!%p1450_p4)
}
   0xa   :  { %s1457_s27 = smov 64   ;;  %s1458_s28 = smov 4  }
   0xb   :  { %28 = dma.hbm_to_vmem [thread:$0]  %s1707_s2, 6144, %s23_s25, [#allocation3], %s1457_s27, %s1457_s27, %s1458_s28  }
   0xc   :  { %1454 = dma.done.wait [#allocation3], 6144  }
   0xd   :  { %1455 = vsyncadd [#allocation3], 4294961152  ;;  %v1459_v0 = vmov 0.0   ;;  %vm1460_vm0 = vmmov 0   ;;  %v1352_v1 = vld [vmem:[%s1706_s1 + $0x8] sm:$0xff]   ;;  %v1353_v2 = vld [vmem:[%s1706_s1] sm:$0xff]  }
   0xe   :  { %1198 = vmatprep.subr.bf16.mxu0 %v1459_v0  ;;  %1202 = vmatprep.mubr.msk.bf16.mxu0 %vm1460_vm0, %v1459_v0  ;;  %v41_v3 = vld [vmem:[%s1705_s0] sm:$0xff]  ;;  %v1354_v4 = vld [vmem:[#allocation2 + $0x38] sm:$0xff]   ;;  %v1355_v6 = vld [vmem:[#allocation2 + $0x30] sm:$0xff]   ;;  %vm64_vm1 = vcmask 261120   ;;  %vm1041_vm2 = vcmask 15360  }
   0xf   :  { %1206 = vmatprep.subr.bf16.mxu1 %v1459_v0  ;;  %1222 = vmatprep.mubr.msk.bf16.mxu1 %vm1460_vm0, %v1459_v0  ;;  %v42_v5 = vpack.c.bf16 %v41_v3, %v41_v3  ;;  %v1356_v7 = vld [vmem:[#allocation2 + $0x28] sm:$0xff]   ;;  %v1357_v8 = vld [vmem:[#allocation2 + $0x20] sm:$0xff]   ;;  %v1358_v9 = vld [vmem:[#allocation2 + $0x18] sm:$0xff]  }
  0x10   :  { %1199 = vmatpush3.bf16.msra.mxu0 %v1352_v1  ;;  %1207 = vmatpush3.bf16.msra.mxu1 %v1354_v4  ;;  %v1359_v10 = vld [vmem:[#allocation2 + $0x10] sm:$0xff]   ;;  %v1360_v11 = vld [vmem:[#allocation2 + $0x8] sm:$0xff]   ;;  %v1361_v12 = vld [vmem:[#allocation2] sm:$0xff]  }
  0x11   :  { %1200 = vmatprep.subr.bf16.mxu0 %v1459_v0  ;;  %1208 = vmatprep.subr.bf16.mxu1 %v1459_v0  ;;  %v1362_v13 = vld [vmem:[#allocation2 + $0x78] sm:$0xff]   ;;  %v1363_v14 = vld [vmem:[#allocation2 + $0x70] sm:$0xff]   ;;  %v1364_v15 = vld [vmem:[#allocation2 + $0x68] sm:$0xff]  }
  0x12   :  { %v1365_v16 = vld [vmem:[#allocation2 + $0x60] sm:$0xff]   ;;  %v1366_v17 = vld [vmem:[#allocation2 + $0x58] sm:$0xff]   ;;  %v1367_v18 = vld [vmem:[#allocation2 + $0x50] sm:$0xff]  }
  0x13   :  { %v1048_v19 = vld [vmem:[%s1710_s5] ss:$0 sm:$0xff]  ;;  %v1368_v27 = vld [vmem:[#allocation2 + $0x48] sm:$0xff]   ;;  %v1370_v29 = vld [vmem:[#allocation2 + $0xb8] sm:$0xff]  }
  0x14   :  { %1201 = vmatpush3.bf16.msra.mxu0 %v1353_v2  ;;  %1209 = vmatpush3.bf16.msra.mxu1 %v1355_v6  ;;  %v1369_v28 = vld [vmem:[#allocation2 + $0x40] sm:$0xff]   ;;  %v1371_v30 = vld [vmem:[#allocation2 + $0xb0] sm:$0xff]   ;;  %v1372_v31 = vld [vmem:[#allocation2 + $0xa8] sm:$0xff]  }
  0x15   :  { %1226 = vmatprep.subr.bf16.mxu0 %v1459_v0  ;;  %1210 = vmatprep.subr.bf16.mxu1 %v1459_v0  ;;  %v1373_v32 = vld [vmem:[#allocation2 + $0xa0] sm:$0xff]   ;;  %v1374_v33 = vld [vmem:[#allocation2 + $0x98] sm:$0xff]   ;;  %v1375_v34 = vld [vmem:[#allocation2 + $0x90] sm:$0xff]  }
  0x16   :  { %v1052_v35 = vld [vmem:[%s1710_s5 + $0x1] ss:$0 sm:$0xff]  ;;  %v1376_v43 = vld [vmem:[#allocation2 + $0x88] sm:$0xff]   ;;  %v1378_v45 = vld [vmem:[#allocation2 + $0xf8] sm:$0xff]  }
  0x17   :  { %1203 = vmatmul.mubr.msk.bf16.vlgmr.msra.gmra.mxu0 %vm64_vm1, %v42_v5  ;;  %v1377_v44 = vld [vmem:[#allocation2 + $0x80] sm:$0xff]   ;;  %v1379_v46 = vld [vmem:[#allocation2 + $0xf0] sm:$0xff]   ;;  %v1380_v47 = vld [vmem:[#allocation2 + $0xe8] sm:$0xff]  }
  0x18   :  { %1242 = vmatprep.mubr.msk.bf16.mxu0 %vm1460_vm0, %v1459_v0  ;;  %1211 = vmatpush3.bf16.msra.mxu1 %v1356_v7  ;;  %v1381_v48 = vld [vmem:[#allocation2 + $0xe0] sm:$0xff]   ;;  %v1382_v49 = vld [vmem:[#allocation2 + $0xd8] sm:$0xff]   ;;  %v1383_v50 = vld [vmem:[#allocation2 + $0xd0] sm:$0xff]  }
  0x19   :  { %1212 = vmatprep.subr.bf16.mxu1 %v1459_v0  ;;  %1227 = vmatpush3.bf16.msra.mxu0 %v1362_v13  ;;  %v1061_v51 = vld [vmem:[%s1710_s5 + $0x2] ss:$0 sm:$0xff]  ;;  %v1384_v60 = vld [vmem:[#allocation2 + $0xc8] sm:$0xff]   ;;  %v1386_v62 = vld [vmem:[#allocation2 + $0x138] sm:$0xff]  }
  0x1a   :  { %1228 = vmatprep.subr.bf16.mxu0 %v1459_v0  ;;  %v1385_v61 = vld [vmem:[#allocation2 + $0xc0] sm:$0xff]   ;;  %v1387_v63 = vld [vmem:[#allocation2 + $0x130] sm:$0xff]   ;;  %v1388_v1 = vld [vmem:[#allocation2 + $0x128] sm:$0xff]  }
  0x1b   :  { %v1389_v2 = vld [vmem:[#allocation2 + $0x120] sm:$0xff]   ;;  %v1390_v3 = vld [vmem:[#allocation2 + $0x118] sm:$0xff]   ;;  %v1391_v4 = vld [vmem:[#allocation2 + $0x110] sm:$0xff]  }
  0x1c   :  { %1213 = vmatpush3.bf16.msra.mxu1 %v1357_v8  ;;  %v1070_v5 = vld [vmem:[%s1710_s5 + $0x3] ss:$0 sm:$0xff]  ;;  %v1392_v13 = vld [vmem:[#allocation2 + $0x108] sm:$0xff]  }
  0x1d   :  { %1214 = vmatprep.subr.bf16.mxu1 %v1459_v0  ;;  %1229 = vmatpush3.bf16.msra.mxu0 %v1363_v14  ;;  %v1393_v14 = vld [vmem:[#allocation2 + $0x100] sm:$0xff]  }
  0x1e   :  { %1230 = vmatprep.subr.bf16.mxu0 %v1459_v0 }
  0x20   :  { %1215 = vmatpush3.bf16.msra.mxu1 %v1358_v9 }
  0x21   :  { %1216 = vmatprep.subr.bf16.mxu1 %v1459_v0  ;;  %1231 = vmatpush3.bf16.msra.mxu0 %v1364_v15  ;;  %v1394_v15 = vld [vmem:[#allocation2 + $0x178] sm:$0xff]  }
  0x22   :  { %1232 = vmatprep.subr.bf16.mxu0 %v1459_v0 }
  0x24   :  { %1217 = vmatpush3.bf16.msra.mxu1 %v1359_v10 }
  0x25   :  { %1218 = vmatprep.subr.bf16.mxu1 %v1459_v0  ;;  %1233 = vmatpush3.bf16.msra.mxu0 %v1365_v16  ;;  %v1395_v16 = vld [vmem:[#allocation2 + $0x170] sm:$0xff]  }
  0x26   :  { %1234 = vmatprep.subr.bf16.mxu0 %v1459_v0 }
  0x28   :  { %1219 = vmatpush3.bf16.msra.mxu1 %v1360_v11 }
  0x29   :  { %1220 = vmatprep.subr.bf16.mxu1 %v1459_v0  ;;  %1235 = vmatpush3.bf16.msra.mxu0 %v1366_v17  ;;  %v1396_v17 = vld [vmem:[#allocation2 + $0x168] sm:$0xff]  }
  0x2a   :  { %1236 = vmatprep.subr.bf16.mxu0 %v1459_v0 }
  0x2c   :  { %1221 = vmatpush3.bf16.msra.mxu1 %v1361_v12 }
  0x2d   :  { %1246 = vmatprep.subr.bf16.mxu1 %v1459_v0  ;;  %1237 = vmatpush3.bf16.msra.mxu0 %v1367_v18  ;;  %v1397_v18 = vld [vmem:[#allocation2 + $0x160] sm:$0xff]  }
  0x2e   :  { %1238 = vmatprep.subr.bf16.mxu0 %v1459_v0 }
  0x31   :  { %1239 = vmatpush3.bf16.msra.mxu0 %v1368_v27 }
  0x32   :  { %1240 = vmatprep.subr.bf16.mxu0 %v1459_v0 }
  0x35   :  { %1241 = vmatpush3.bf16.msra.mxu0 %v1369_v28 }
  0x36   :  { %1266 = vmatprep.subr.bf16.mxu0 %v1459_v0 }
  0xd7   :  { %v102_v20 = vpop.f32.mrf.mxu0 }
  0xd8   :  { %v103_v21 = vadd.f32 %v1048_v19, %v102_v20  ;;  %v1398_v19 = vld [vmem:[#allocation2 + $0x158] sm:$0xff]   ;;  %v1399_v20 = vld [vmem:[#allocation2 + $0x150] sm:$0xff]  }
  0xd9   :  { %v1204_v22 = vpop.f32.mrf.mxu0 }
  0xda   :  { %v1541_v23 = vmax.f32 %v103_v21, 0.0  ;;  %v1079_v21 = vld [vmem:[%s1710_s5 + $0x4] ss:$0 sm:$0xff] }
  0xdb   :  { %v105_v24 = vpop.f32.mrf.mxu0 }
  0xdc   :  { %v109_v25 = vpack.c.bf16 %v1541_v23, %v1541_v23 }
  0xdd   :  { %v1205_v26 = vpop.f32.mrf.mxu0 }
  0xde   :  { %1223 = vmatmul.mubr.bf16.vlgmr.msra.gmra.mxu1 %v109_v25 }
  0xdf   :  { %1262 = vmatprep.mubr.msk.bf16.mxu1 %vm1460_vm0, %v1459_v0  ;;  %1247 = vmatpush3.bf16.msra.mxu1 %v1370_v29 }
  0xe0   :  { %1248 = vmatprep.subr.bf16.mxu1 %v1459_v0 }
  0xe3   :  { %1249 = vmatpush3.bf16.msra.mxu1 %v1371_v30  ;;  %v1400_v30 = vld [vmem:[#allocation2 + $0x148] sm:$0xff]  }
  0xe4   :  { %1250 = vmatprep.subr.bf16.mxu1 %v1459_v0 }
  0xe7   :  { %1251 = vmatpush3.bf16.msra.mxu1 %v1372_v31  ;;  %v1401_v31 = vld [vmem:[#allocation2 + $0x140] sm:$0xff]  }
  0xe8   :  { %1252 = vmatprep.subr.bf16.mxu1 %v1459_v0 }
  0xeb   :  { %1253 = vmatpush3.bf16.msra.mxu1 %v1373_v32  ;;  %v1402_v32 = vld [vmem:[%s1708_s3 + $0x70] ss:$8 sps:$4 sm:$0xff]  }
  0xec   :  { %1254 = vmatprep.subr.bf16.mxu1 %v1459_v0 }
  0xef   :  { %1255 = vmatpush3.bf16.msra.mxu1 %v1374_v33  ;;  %v1404_v33 = vld [vmem:[%s1708_s3 + $0x74] ss:$8 sps:$4 sm:$0xff]  }
  0xf0   :  { %1256 = vmatprep.subr.bf16.mxu1 %v1459_v0 }
  0xf3   :  { %1257 = vmatpush3.bf16.msra.mxu1 %v1375_v34  ;;  %v1407_v34 = vld [vmem:[%s1708_s3 + $0x64] ss:$8 sps:$4 sm:$0xff]  }
  0xf4   :  { %1258 = vmatprep.subr.bf16.mxu1 %v1459_v0 }
  0xf7   :  { %1259 = vmatpush3.bf16.msra.mxu1 %v1376_v43  ;;  %v1417_v43 = vld [vmem:[%s1708_s3 + $0x20] ss:$8 sps:$4 sm:$0xff]  }
  0xf8   :  { %1260 = vmatprep.subr.bf16.mxu1 %v1459_v0 }
  0xfb   :  { %1261 = vmatpush3.bf16.msra.mxu1 %v1377_v44  ;;  %v1088_v44 = vld [vmem:[%s1710_s5 + $0x5] ss:$0 sm:$0xff] }
  0xfc   :  { %1286 = vmatprep.subr.bf16.mxu1 %v1459_v0 }
 0x19e   :  { %v213_v36 = vpop.f32.mrf.mxu1 }
 0x19f   :  { %v214_v37 = vadd.f32 %v1052_v35, %v213_v36  ;;  %v1405_v35 = vld [vmem:[%s1708_s3 + $0x60] ss:$8 sps:$4 sm:$0xff]   ;;  %v1410_v36 = vld [vmem:[%s1708_s3 + $0x54] ss:$8 sps:$4 sm:$0xff]  }
 0x1a0   :  { %v1224_v38 = vpop.f32.mrf.mxu1 }
 0x1a1   :  { %v219_v39 = vmax.f32 %v214_v37, 0.0  ;;  %v1408_v37 = vld [vmem:[%s1708_s3 + $0x50] ss:$8 sps:$4 sm:$0xff]   ;;  %v1413_v38 = vld [vmem:[%s1708_s3 + $0x44] ss:$8 sps:$4 sm:$0xff]  }
 0x1a2   :  { %v216_v40 = vpop.f32.mrf.mxu1 }
 0x1a3   :  { %v220_v41 = vpack.c.bf16 %v219_v39, %v219_v39  ;;  %v1411_v39 = vld [vmem:[%s1708_s3 + $0x40] ss:$8 sps:$4 sm:$0xff]   ;;  %v1416_v40 = vld [vmem:[%s1708_s3 + $0x34] ss:$8 sps:$4 sm:$0xff]  }
 0x1a4   :  { %v1225_v42 = vpop.f32.mrf.mxu1 }
 0x1a5   :  { %1243 = vmatmul.mubr.bf16.vlgmr.msra.gmra.mxu0 %v220_v41  ;;  %v1414_v41 = vld [vmem:[%s1708_s3 + $0x30] ss:$8 sps:$4 sm:$0xff]   ;;  %v1419_v42 = vld [vmem:[%s1708_s3 + $0x24] ss:$8 sps:$4 sm:$0xff]  }
 0x1a6   :  { %1282 = vmatprep.mubr.msk.bf16.mxu0 %vm1460_vm0, %v1459_v0  ;;  %1267 = vmatpush3.bf16.msra.mxu0 %v1378_v45 }
 0x1a7   :  { %1268 = vmatprep.subr.bf16.mxu0 %v1459_v0 }
 0x1aa   :  { %1269 = vmatpush3.bf16.msra.mxu0 %v1379_v46 }
 0x1ab   :  { %1270 = vmatprep.subr.bf16.mxu0 %v1459_v0 }
 0x1ae   :  { %1271 = vmatpush3.bf16.msra.mxu0 %v1380_v47 }
 0x1af   :  { %1272 = vmatprep.subr.bf16.mxu0 %v1459_v0 }
 0x1b2   :  { %1273 = vmatpush3.bf16.msra.mxu0 %v1381_v48 }
 0x1b3   :  { %1274 = vmatprep.subr.bf16.mxu0 %v1459_v0 }
 0x1b6   :  { %1275 = vmatpush3.bf16.msra.mxu0 %v1382_v49 }
 0x1b7   :  { %1276 = vmatprep.subr.bf16.mxu0 %v1459_v0 }
 0x1ba   :  { %1277 = vmatpush3.bf16.msra.mxu0 %v1383_v50 }
 0x1bb   :  { %1278 = vmatprep.subr.bf16.mxu0 %v1459_v0 }
 0x1be   :  { %1279 = vmatpush3.bf16.msra.mxu0 %v1384_v60  ;;  %v1429_v60 = vld [vmem:[%s1709_s4 + $0x20] sm:$0xff]  }
 0x1bf   :  { %1280 = vmatprep.subr.bf16.mxu0 %v1459_v0 }
 0x1c2   :  { %1281 = vmatpush3.bf16.msra.mxu0 %v1385_v61  ;;  %v1430_v61 = vld [vmem:[%s1709_s4 + $0x18] sm:$0xff]  }
 0x1c3   :  { %1306 = vmatprep.subr.bf16.mxu0 %v1459_v0 }
 0x265   :  { %v325_v52 = vpop.f32.mrf.mxu0 }
 0x266   :  { %v326_v53 = vadd.f32 %v1061_v51, %v325_v52  ;;  %v1422_v52 = vld [vmem:[%s1708_s3 + $0x14] ss:$8 sps:$4 sm:$0xff]  }
 0x267   :  { %v1244_v54 = vpop.f32.mrf.mxu0 }
 0x268   :  { %v331_v55 = vmax.f32 %v326_v53, 0.0  ;;  %v1420_v53 = vld [vmem:[%s1708_s3 + $0x10] ss:$8 sps:$4 sm:$0xff]   ;;  %v1425_v54 = vld [vmem:[%s1708_s3 + $0x4] ss:$8 sps:$4 sm:$0xff]  }
 0x269   :  { %v328_v56 = vpop.f32.mrf.mxu0 }
 0x26a   :  { %v1572_v57 = vadd.f32 %v331_v55, %v1541_v23  ;;  %v1423_v55 = vld [vmem:[%s1708_s3] ss:$8 sps:$4 sm:$0xff]   ;;  %v1461_v56 = vmov 0  }
 0x26b   :  { %v1245_v58 = vpop.f32.mrf.mxu0 }
 0x26c   :  { %v333_v59 = vpack.c.bf16 %v1572_v57, %v1572_v57  ;;  %v1427_v58 = vld [vmem:[%s1709_s4 + $0x30] sm:$0xff]  }
 0x26e   :  { %1263 = vmatmul.mubr.bf16.vlgmr.msra.gmra.mxu1 %v333_v59  ;;  %v1428_v59 = vld [vmem:[%s1709_s4 + $0x28] sm:$0xff]  }
 0x26f   :  { %1302 = vmatprep.mubr.msk.bf16.mxu1 %vm1460_vm0, %v1459_v0  ;;  %1287 = vmatpush3.bf16.msra.mxu1 %v1386_v62  ;;  %v1431_v62 = vld [vmem:[%s1709_s4 + $0x10] sm:$0xff]  }
 0x270   :  { %1288 = vmatprep.subr.bf16.mxu1 %v1459_v0 }
 0x273   :  { %1289 = vmatpush3.bf16.msra.mxu1 %v1387_v63  ;;  %v1097_v63 = vld [vmem:[%s1710_s5 + $0x6] ss:$0 sm:$0xff] }
 0x274   :  { %1290 = vmatprep.subr.bf16.mxu1 %v1459_v0 }
 0x277   :  { %1291 = vmatpush3.bf16.msra.mxu1 %v1388_v1 }
 0x278   :  { %1292 = vmatprep.subr.bf16.mxu1 %v1459_v0 }
 0x27b   :  { %1293 = vmatpush3.bf16.msra.mxu1 %v1389_v2 }
 0x27c   :  { %1294 = vmatprep.subr.bf16.mxu1 %v1459_v0 }
 0x27f   :  { %1295 = vmatpush3.bf16.msra.mxu1 %v1390_v3 }
 0x280   :  { %1296 = vmatprep.subr.bf16.mxu1 %v1459_v0 }
 0x283   :  { %1297 = vmatpush3.bf16.msra.mxu1 %v1391_v4 }
 0x284   :  { %1298 = vmatprep.subr.bf16.mxu1 %v1459_v0 }
 0x287   :  { %1299 = vmatpush3.bf16.msra.mxu1 %v1392_v13 }
 0x288   :  { %1300 = vmatprep.subr.bf16.mxu1 %v1459_v0 }
 0x28b   :  { %1301 = vmatpush3.bf16.msra.mxu1 %v1393_v14 }
 0x28c   :  { %880 = vmatprep.subr.bf16.mxu1 %v1404_v33 }
 0x32e   :  { %v438_v6 = vpop.f32.mrf.mxu1 }
 0x32f   :  { %v439_v7 = vadd.f32 %v1070_v5, %v438_v6 }
 0x330   :  { %v1264_v8 = vpop.f32.mrf.mxu1 }
 0x331   :  { %v444_v9 = vmax.f32 %v439_v7, 0.0 }
 0x332   :  { %v441_v10 = vpop.f32.mrf.mxu1 }
 0x333   :  { %v445_v11 = vpack.c.bf16 %v444_v9, %v444_v9  ;;  %v1432_v9 = vld [vmem:[%s1709_s4 + $0x8] sm:$0xff]   ;;  %v1433_v10 = vld [vmem:[%s1709_s4] sm:$0xff]  }
 0x334   :  { %v1265_v12 = vpop.f32.mrf.mxu1 }
 0x335   :  { %1283 = vmatmul.mubr.bf16.vlgmr.msra.gmra.mxu0 %v445_v11  ;;  %v1122_v11 = vld [vmem:[%s1710_s5 + $0x7] ss:$0 sm:$0xff] }
 0x336   :  { %1322 = vmatprep.mubr.msk.bf16.mxu0 %vm1460_vm0, %v1459_v0  ;;  %1307 = vmatpush3.bf16.msra.mxu0 %v1394_v15 }
 0x337   :  { %1308 = vmatprep.subr.bf16.mxu0 %v1459_v0 }
 0x33a   :  { %1309 = vmatpush3.bf16.msra.mxu0 %v1395_v16 }
 0x33b   :  { %1310 = vmatprep.subr.bf16.mxu0 %v1459_v0 }
 0x33e   :  { %1311 = vmatpush3.bf16.msra.mxu0 %v1396_v17 }
 0x33f   :  { %1312 = vmatprep.subr.bf16.mxu0 %v1459_v0 }
 0x342   :  { %1313 = vmatpush3.bf16.msra.mxu0 %v1397_v18 }
 0x343   :  { %1314 = vmatprep.subr.bf16.mxu0 %v1459_v0 }
 0x346   :  { %1315 = vmatpush3.bf16.msra.mxu0 %v1398_v19 }
 0x347   :  { %1316 = vmatprep.subr.bf16.mxu0 %v1459_v0 }
 0x34a   :  { %1317 = vmatpush3.bf16.msra.mxu0 %v1399_v20 }
 0x34b   :  { %1318 = vmatprep.subr.bf16.mxu0 %v1459_v0 }
 0x34e   :  { %1319 = vmatpush3.bf16.msra.mxu0 %v1400_v30 }
 0x34f   :  { %1320 = vmatprep.subr.bf16.mxu0 %v1459_v0 }
 0x352   :  { %1321 = vmatpush3.bf16.msra.mxu0 %v1401_v31 }
 0x353   :  { %1326 = vmatprep.subr.bf16.mxu0 %v1459_v0 }
 0x3f5   :  { %v550_v22 = vpop.f32.mrf.mxu0 }
 0x3f6   :  { %v551_v23 = vadd.f32 %v1079_v21, %v550_v22 }
 0x3f7   :  { %v1284_v24 = vpop.f32.mrf.mxu0 }
 0x3f8   :  { %v556_v25 = vmax.f32 %v551_v23, 0.0 }
 0x3f9   :  { %v553_v26 = vpop.f32.mrf.mxu0 }
 0x3fa   :  { %v1602_v27 = vadd.f32 %v556_v25, %v1572_v57  ;;  %v1426_v57 = vld [vmem:[%s1709_s4 + $0x38] sm:$0xff]  }
 0x3fb   :  { %v1285_v28 = vpop.f32.mrf.mxu0 }
 0x3fc   :  { %v558_v29 = vpack.c.bf16 %v1602_v27, %v1602_v27 }
 0x3fe   :  { %1303 = vmatmul.mubr.bf16.vlgmr.msra.gmra.mxu1 %v558_v29 }
 0x3ff   :  { %881 = vmatpush1.bf16.msra.mxu1 %v1402_v32  ;;  %912 = vmatprep.mubr.bf16.mxu1 %v1461_v56 }
 0x400   :  { %882 = vmatprep.subr.bf16.mxu1 %v1407_v34 }
 0x403   :  { %883 = vmatpush1.bf16.msra.mxu1 %v1405_v35 }
 0x404   :  { %884 = vmatprep.subr.bf16.mxu1 %v1410_v36 }
 0x407   :  { %885 = vmatpush1.bf16.msra.mxu1 %v1408_v37 }
 0x408   :  { %886 = vmatprep.subr.bf16.mxu1 %v1413_v38 }
 0x40b   :  { %887 = vmatpush1.bf16.msra.mxu1 %v1411_v39 }
 0x40c   :  { %888 = vmatprep.subr.bf16.mxu1 %v1416_v40 }
 0x40f   :  { %889 = vmatpush1.bf16.msra.mxu1 %v1414_v41 }
 0x410   :  { %890 = vmatprep.subr.bf16.mxu1 %v1419_v42 }
 0x413   :  { %891 = vmatpush1.bf16.msra.mxu1 %v1417_v43 }
 0x414   :  { %892 = vmatprep.subr.bf16.mxu1 %v1422_v52 }
 0x417   :  { %893 = vmatpush1.bf16.msra.mxu1 %v1420_v53 }
 0x418   :  { %894 = vmatprep.subr.bf16.mxu1 %v1425_v54 }
 0x41b   :  { %895 = vmatpush1.bf16.msra.mxu1 %v1423_v55 }
 0x4be   :  { %v663_v45 = vpop.f32.mrf.mxu1 }
 0x4bf   :  { %v664_v46 = vadd.f32 %v1088_v44, %v663_v45 }
 0x4c0   :  { %v1304_v47 = vpop.f32.mrf.mxu1 }
 0x4c1   :  { %v669_v48 = vmax.f32 %v664_v46, 0.0 }
 0x4c2   :  { %v666_v49 = vpop.f32.mrf.mxu1 }
 0x4c3   :  { %v670_v50 = vpack.c.bf16 %v669_v48, %v669_v48 }
 0x4c4   :  { %v1305_v51 = vpop.f32.mrf.mxu1 }
 0x4c5   :  { %1323 = vmatmul.mubr.bf16.vlgmr.msra.gmra.mxu0 %v670_v50 }
 0x4c6   :  { %1342 = vmatprep.mubr.msk.bf16.mxu0 %vm1460_vm0, %v1459_v0  ;;  %1327 = vmatpush3.bf16.msra.mxu0 %v1426_v57 }
 0x4c7   :  { %1328 = vmatprep.subr.bf16.mxu0 %v1459_v0 }
 0x4ca   :  { %1329 = vmatpush3.bf16.msra.mxu0 %v1427_v58 }
 0x4cb   :  { %1330 = vmatprep.subr.bf16.mxu0 %v1459_v0 }
 0x4ce   :  { %1331 = vmatpush3.bf16.msra.mxu0 %v1428_v59 }
 0x4cf   :  { %1332 = vmatprep.subr.bf16.mxu0 %v1459_v0 }
 0x4d2   :  { %1333 = vmatpush3.bf16.msra.mxu0 %v1429_v60 }
 0x4d3   :  { %1334 = vmatprep.subr.bf16.mxu0 %v1459_v0 }
 0x4d6   :  { %1335 = vmatpush3.bf16.msra.mxu0 %v1430_v61 }
 0x4d7   :  { %1336 = vmatprep.subr.bf16.mxu0 %v1459_v0 }
 0x4da   :  { %1337 = vmatpush3.bf16.msra.mxu0 %v1431_v62 }
 0x4db   :  { %1338 = vmatprep.subr.bf16.mxu0 %v1459_v0 }
 0x4de   :  { %1339 = vmatpush3.bf16.msra.mxu0 %v1432_v9 }
 0x4df   :  { %1340 = vmatprep.subr.bf16.mxu0 %v1459_v0  ;;  %v1131_v0 = vld [vmem:[%s1711_s6] ss:$0 sm:$0xff] }
 0x4e2   :  { %1341 = vmatpush3.bf16.msra.mxu0 %v1433_v10 }
 0x585   :  { %v775_v1 = vpop.f32.mrf.mxu0 }
 0x586   :  { %v776_v2 = vadd.f32 %v1097_v63, %v775_v1 }
 0x587   :  { %v1324_v3 = vpop.f32.mrf.mxu0 }
 0x588   :  { %v781_v4 = vmax.f32 %v776_v2, 0.0 }
 0x589   :  { %v778_v5 = vpop.f32.mrf.mxu0 }
 0x58a   :  { %v782_v6 = vadd.f32 %v781_v4, %v1602_v27 }
 0x58b   :  { %v1325_v7 = vpop.f32.mrf.mxu0 }
 0x58c   :  { %v783_v8 = vpack.c.bf16 %v782_v6, %v782_v6 }
 0x58e   :  { %913 = vmatmul.mubr.bf16.vlgmr.msra.gmra.mxu1 %v783_v8 }
 0x64e   :  { %v914_v12 = vpop.f32.mrf.mxu1 }
 0x64f   :  { %v926_v13 = vadd.f32 %v1122_v11, %v914_v12 }
 0x650   :  { %v916_v14 = vpop.f32.mrf.mxu1 }
 0x651   :  { %v927_v15 = vmax.f32 %v926_v13, 0.0 }
 0x652   :  { %v918_v16 = vpop.f32.mrf.mxu1 }
 0x653   :  { %v928_v17 = vpack.c.bf16 %v927_v15, %v927_v15 }
 0x654   :  { %v919_v18 = vpop.f32.mrf.mxu1 }
 0x655   :  { %1343 = vmatmul.mubr.bf16.vlgmr.msra.gmra.mxu0 %v928_v17 }
 0x715   :  { %v1027_v19 = vpop.f32.mrf.mxu0 }
 0x716   :  { %v1028_v20 = vadd.f32 %v1027_v19, %v916_v14 }
 0x717   :  { %v1344_v21 = vpop.f32.mrf.mxu0 }
 0x718   :  { %v1040_v22 = vadd.f32 %v1131_v0, %v1028_v20 }
 0x719   :  { %v1030_v23 = vpop.f32.mrf.mxu0 }
 0x71a   :  { %1042 = vst.msk [vmem:[%s1712_s7] sm:$0xff] %vm1041_vm2, %v1040_v22 }
 0x71b   :  { %v1345_v24 = vpop.f32.mrf.mxu0 }
 0x71c   :  { %1047 = vsyncpa [#allocation3], 1 }

</bundles_post_ra>
